<compile_context>
chip_gen: v5e
topology: v5e:2x2
jax: 0.10.0
libtpu: 0.0.40
codegen_flags: <defaults>
</compile_context>

<pallas_src>
import math

import jax
import jax.numpy as jnp
from jax.experimental import pallas as pl
from jax.experimental.pallas import tpu as pltpu


_TM_CAP = 256           # rows per tile
_TN_CAP = 512           # output features per tile (tiled fallback)
_TK_CAP = 2048          # contraction per tile (tiled fallback)
_LN_EPS = 1e-5
_VMEM_BUDGET = 28 * 1024 * 1024   # stay under v7x's 32 MiB scoped-VMEM default
_VMEM_LIMIT = 32 * 1024 * 1024


def _round_up(x, m):
    return ((x + m - 1) // m) * m


def _pick_tile(dim_pad, cap):
    """Largest multiple of 128 that divides dim_pad and is <= cap."""
    t = min(dim_pad, max(128, (cap // 128) * 128))
    while dim_pad % t != 0:
        t -= 128
    return t


def _apply_act(g, act):
    if act == "sigmoid":
        return 1.0 / (1.0 + jnp.exp(-g))
    if act == "tanh":
        return jnp.tanh(g)
    return jnp.maximum(g, 0.0)


# ---------------------------------------------------------------------------
# Fused forward kernel (weights resident in VMEM, grid over row tiles only):
#   msg_t = msg @ Wm_eff + bm ; gate = act(hid @ Wg_eff + bg)
#   out   = LayerNorm(hid + gate * msg_t)
# Padded columns of all operands are exactly zero, so mean/var via sum/H is exact.
# ---------------------------------------------------------------------------
def _make_fused_kernel(act, inv_h):
    def kernel(hid_ref, msg_ref, wm_ref, bm_ref, wg_ref, bg_ref,
               gam_ref, bet_ref, o_ref):
        hid32 = hid_ref[...].astype(jnp.float32)
        msg_t = jnp.dot(msg_ref[...].astype(jnp.bfloat16), wm_ref[...],
                        preferred_element_type=jnp.float32) + bm_ref[...]
        g = jnp.dot(hid_ref[...].astype(jnp.bfloat16), wg_ref[...],
                    preferred_element_type=jnp.float32) + bg_ref[...]
        g = _apply_act(g, act)
        y = hid32 + g * msg_t
        s1 = jnp.sum(y, axis=-1, keepdims=True)
        s2 = jnp.sum(y * y, axis=-1, keepdims=True)
        mean = s1 * inv_h
        var = s2 * inv_h - mean * mean
        inv = jax.lax.rsqrt(var + _LN_EPS)
        o_ref[...] = ((y - mean) * inv * gam_ref[...] + bet_ref[...]).astype(o_ref.dtype)
    return kernel


# ---------------------------------------------------------------------------
# Tiled fallback kernels (large H): merged-weight linear + fused gate/LayerNorm.
# ---------------------------------------------------------------------------
def _linear_kernel(x_ref, w_ref, bias_ref, o_ref, acc_ref):
    k = pl.program_id(2)

    @pl.when(k == 0)
    def _():
        acc_ref[...] = jnp.broadcast_to(bias_ref[...], acc_ref.shape)

    acc_ref[...] += jnp.dot(x_ref[...].astype(jnp.bfloat16), w_ref[...],
                            preferred_element_type=jnp.float32)

    @pl.when(k == pl.num_programs(2) - 1)
    def _():
        o_ref[...] = acc_ref[...].astype(o_ref.dtype)


def _make_gate_norm_kernel(act, inv_h):
    def kernel(hid_ref, msg_ref, gate_ref, gam_ref, bet_ref, o_ref):
        hid = hid_ref[...].astype(jnp.float32)
        msg = msg_ref[...].astype(jnp.float32)
        g = _apply_act(gate_ref[...].astype(jnp.float32), act)
        y = hid + g * msg
        s1 = jnp.sum(y, axis=-1, keepdims=True)
        s2 = jnp.sum(y * y, axis=-1, keepdims=True)
        mean = s1 * inv_h
        var = s2 * inv_h - mean * mean
        inv = jax.lax.rsqrt(var + _LN_EPS)
        o_ref[...] = ((y - mean) * inv * gam_ref[...] + bet_ref[...]).astype(o_ref.dtype)
    return kernel


def _linear_padded(x_p, w, b, tm, out_dtype=jnp.bfloat16):
    """y = x @ w + b on padded operands (bf16 output, f32 VMEM accumulator)."""
    M_pad, K_pad = x_p.shape
    _, N_pad = w.shape
    tk = _pick_tile(K_pad, _TK_CAP)
    tn = _pick_tile(N_pad, _TN_CAP)

    def step_bytes(tk_, tn_):
        return (2 * (tm * tk_ * x_p.dtype.itemsize + tk_ * tn_ * 2
                     + tm * tn_ * jnp.dtype(out_dtype).itemsize)
                + tm * tn_ * 4)

    while step_bytes(tk, tn) > _VMEM_BUDGET and tn > 128:
        tn = _pick_tile(N_pad, tn - 128)
    while step_bytes(tk, tn) > _VMEM_BUDGET and tk > 128:
        tk = _pick_tile(K_pad, tk - 128)

    return pl.pallas_call(
        _linear_kernel,
        out_shape=jax.ShapeDtypeStruct((M_pad, N_pad), out_dtype),
        grid=(M_pad // tm, N_pad // tn, K_pad // tk),
        in_specs=[
            pl.BlockSpec((tm, tk), lambda i, j, k: (i, k)),
            pl.BlockSpec((tk, tn), lambda i, j, k: (k, j)),
            pl.BlockSpec((1, tn), lambda i, j, k: (0, j)),
        ],
        out_specs=pl.BlockSpec((tm, tn), lambda i, j, k: (i, j)),
        scratch_shapes=[pltpu.VMEM((tm, tn), jnp.float32)],
        compiler_params=pltpu.CompilerParams(
            dimension_semantics=("parallel", "parallel", "arbitrary"),
            vmem_limit_bytes=_VMEM_LIMIT),
    )(x_p, w, b)


# ---------------------------------------------------------------------------
# One-time parameter packing: merge LoRA into the base weight (eval mode),
# transpose to [in, out], pad to 128-lane multiples, cast to bf16.
# ---------------------------------------------------------------------------
def prepare_gladder_params(hidden_size, w_msg, b_msg, a_msg, B_msg,
                           w_gate, b_gate, a_gate, B_gate,
                           ln_gamma, ln_beta, scaling,
                           compute_dtype=jnp.bfloat16):
    H = hidden_size
    H_pad = _round_up(H, 128)

    def merge(w, a, b):
        # PyTorch layouts: W [out, in], A [r, in], B [out, r]
        w_eff = jnp.transpose(w).astype(jnp.float32) + scaling * (
            jnp.transpose(a).astype(jnp.float32)
            @ jnp.transpose(b).astype(jnp.float32))
        return jnp.zeros((H_pad, H_pad), compute_dtype).at[:H, :H].set(
            w_eff.astype(compute_dtype))

    def pad_vec(v):
        return jnp.zeros((1, H_pad), jnp.float32).at[0, :H].set(
            v.astype(jnp.float32))

    return dict(
        H=H, H_pad=H_pad,
        wm=merge(w_msg, a_msg, B_msg), bm=pad_vec(b_msg),
        wg=merge(w_gate, a_gate, B_gate), bg=pad_vec(b_gate),
        gamma=pad_vec(ln_gamma), beta=pad_vec(ln_beta),
    )


def graph_message_passing(x, edge_index, num_nodes):
    """GCN-normalized message passing with self-loops and mean aggregation.

    Matches GraphMessagePassing(mp_type='mean', add_self_loops=True, normalize=True).
    """
    # TODO(synk): data-dependent edge gather/scatter stays in plain JAX/XLA; a Pallas
    # version would need scalar-prefetched edge lists + manual DMA.
    loops = jnp.arange(num_nodes, dtype=edge_index.dtype)
    row = jnp.concatenate([edge_index[0], loops])   # source nodes (j)
    col = jnp.concatenate([edge_index[1], loops])   # target nodes (i)

    ones = jnp.ones_like(col, dtype=x.dtype)
    deg = jnp.zeros((num_nodes,), x.dtype).at[col].add(ones)   # in-degree incl. self-loop
    deg_inv_sqrt = jnp.where(deg > 0, jax.lax.rsqrt(deg), 0.0)
    norm = deg_inv_sqrt[row] * deg_inv_sqrt[col]

    msgs = norm[:, None] * x[row]                               # [E, H]
    agg = jnp.zeros_like(x).at[col].add(msgs)                   # scatter-sum per target
    cnt = jnp.maximum(deg, 1.0)                                 # aggr='mean' (reuse deg)
    return agg / cnt[:, None]


def g_ladder_forward(hidden_states, edge_index, params,
                     gate_activation="sigmoid", force_tiled=False):
    # TODO(synk): the host-side edge-index validation / empty-edge fallback of the
    # PyTorch forward is dynamic control flow and is not reproduced here.
    M, H = hidden_states.shape
    assert H == params["H"]
    H_pad = params["H_pad"]

    msg = graph_message_passing(hidden_states, edge_index, M)

    tm = min(_TM_CAP, _round_up(M, 16))     # bf16 sublane packing: multiple of 16
    M_pad = _round_up(M, tm)

    def pad2d(a):
        if M_pad == M and H_pad == H:
            return a
        return jnp.zeros((M_pad, H_pad), a.dtype).at[:M, :H].set(a)

    hid_p = pad2d(hidden_states)
    msg_p = pad2d(msg)
    inv_h = 1.0 / float(H)

    # VMEM estimate for the fully fused path (both merged HxH weights resident).
    fused_bytes = (2 * 2 * H_pad * H_pad * 2            # 2 weights, bf16, double-buffered
                   + 2 * tm * H_pad * (4 + 4 + 4)       # hid/msg in + out (f32), double-buffered
                   + 6 * H_pad * 4)
    use_fused = (not force_tiled) and fused_bytes <= _VMEM_BUDGET

    if use_fused:
        out = pl.pallas_call(
            _make_fused_kernel(gate_activation, inv_h),
            out_shape=jax.ShapeDtypeStruct((M_pad, H_pad), hidden_states.dtype),
            grid=(M_pad // tm,),
            in_specs=[
                pl.BlockSpec((tm, H_pad), lambda i: (i, 0)),      # hidden
                pl.BlockSpec((tm, H_pad), lambda i: (i, 0)),      # msg
                pl.BlockSpec((H_pad, H_pad), lambda i: (0, 0)),   # merged W_msg
                pl.BlockSpec((1, H_pad), lambda i: (0, 0)),       # b_msg
                pl.BlockSpec((H_pad, H_pad), lambda i: (0, 0)),   # merged W_gate
                pl.BlockSpec((1, H_pad), lambda i: (0, 0)),       # b_gate
                pl.BlockSpec((1, H_pad), lambda i: (0, 0)),       # gamma
                pl.BlockSpec((1, H_pad), lambda i: (0, 0)),       # beta
            ],
            out_specs=pl.BlockSpec((tm, H_pad), lambda i: (i, 0)),
            compiler_params=pltpu.CompilerParams(
                dimension_semantics=("parallel",),
                vmem_limit_bytes=_VMEM_LIMIT),
        )(hid_p, msg_p, params["wm"], params["bm"], params["wg"], params["bg"],
          params["gamma"], params["beta"])
        return out[:M, :H]

    # Tiled fallback for large H: merged-weight matmuls (bf16 intermediates, no slicing
    # between kernels) followed by the fused gate + LayerNorm kernel.
    msg_t = _linear_padded(msg_p, params["wm"], params["bm"], tm)
    gate_logits = _linear_padded(hid_p, params["wg"], params["bg"], tm)

    out = pl.pallas_call(
        _make_gate_norm_kernel(gate_activation, inv_h),
        out_shape=jax.ShapeDtypeStruct((M_pad, H_pad), hidden_states.dtype),
        grid=(M_pad // tm,),
        in_specs=[
            pl.BlockSpec((tm, H_pad), lambda i: (i, 0)),
            pl.BlockSpec((tm, H_pad), lambda i: (i, 0)),
            pl.BlockSpec((tm, H_pad), lambda i: (i, 0)),
            pl.BlockSpec((1, H_pad), lambda i: (0, 0)),
            pl.BlockSpec((1, H_pad), lambda i: (0, 0)),
        ],
        out_specs=pl.BlockSpec((tm, H_pad), lambda i: (i, 0)),
        compiler_params=pltpu.CompilerParams(
            dimension_semantics=("parallel",),
            vmem_limit_bytes=_VMEM_LIMIT),
    )(hid_p, msg_t, gate_logits, params["gamma"], params["beta"])
    return out[:M, :H]


if __name__ == "__main__":
    num_nodes, hidden_size = 16, 32
    rank, alpha = 16, 32.0
    scaling = alpha / rank

    key = jax.random.PRNGKey(0)
    (k_h, k_wm, k_bm, k_am, k_Bm, k_wg, k_bg, k_ag, k_Bg) = jax.random.split(key, 9)

    hidden_states = jax.random.normal(k_h, (num_nodes, hidden_size), dtype=jnp.float32)

    # Bidirectional ring graph: 32 edges.
    src = jnp.arange(num_nodes, dtype=jnp.int32)
    dst = (src + 1) % num_nodes
    edge_index = jnp.stack([jnp.concatenate([src, dst]),
                            jnp.concatenate([dst, src])])

    bound = 1.0 / math.sqrt(hidden_size)

    def _unif(k, shape, lo, hi):
        return jax.random.uniform(k, shape, minval=lo, maxval=hi, dtype=jnp.float32)

    # message_transform LoRALinear params (PyTorch layouts: W [out,in], A [r,in], B [out,r])
    w_m = _unif(k_wm, (hidden_size, hidden_size), -bound, bound)
    b_m = _unif(k_bm, (hidden_size,), -bound, bound)
    a_m = _unif(k_am, (rank, hidden_size), -bound, bound)
    # NOTE: the module inits lora_B to zeros; use small random values so the LoRA
    # path is exercised numerically here.
    B_m = _unif(k_Bm, (hidden_size, rank), -0.1, 0.1)

    # gate_transform LoRALinear params
    w_g = _unif(k_wg, (hidden_size, hidden_size), -bound, bound)
    b_g = _unif(k_bg, (hidden_size,), -bound, bound)
    a_g = _unif(k_ag, (rank, hidden_size), -bound, bound)
    B_g = _unif(k_Bg, (hidden_size, rank), -0.1, 0.1)

    # LayerNorm params (nn.LayerNorm default init).
    gamma = jnp.ones((hidden_size,), jnp.float32)
    beta = jnp.zeros((hidden_size,), jnp.float32)

    # One-time packing: LoRA merged into base weights, padded, bf16.
    params = prepare_gladder_params(hidden_size, w_m, b_m, a_m, B_m,
                                    w_g, b_g, a_g, B_g, gamma, beta, scaling)

    out_fused = jax.block_until_ready(
        g_ladder_forward(hidden_states, edge_index, params))
    out_tiled = jax.block_until_ready(
        g_ladder_forward(hidden_states, edge_index, params, force_tiled=True))

    # ---- reference (plain JAX, f32) ----
    # Independent dense-adjacency reference for the message passing.
    loops = jnp.arange(num_nodes, dtype=jnp.int32)
    row = jnp.concatenate([edge_index[0], loops])
    col = jnp.concatenate([edge_index[1], loops])
    deg = jnp.zeros((num_nodes,), jnp.float32).at[col].add(1.0)
    dinv = jnp.where(deg > 0, 1.0 / jnp.sqrt(deg), 0.0)
    W_dense = jnp.zeros((num_nodes, num_nodes), jnp.float32).at[col, row].add(
        dinv[col] * dinv[row])
    msg_ref = (W_dense @ hidden_states) / jnp.maximum(deg, 1.0)[:, None]

    def lora_ref(x, w, b, A, B):
        return x @ w.T + b + scaling * ((x @ A.T) @ B.T)

    msg_t_ref = lora_ref(msg_ref, w_m, b_m, a_m, B_m)
    gate_ref = jax.nn.sigmoid(lora_ref(hidden_states, w_g, b_g, a_g, B_g))
    y = hidden_states + gate_ref * msg_t_ref
    mu = y.mean(axis=-1, keepdims=True)
    var = ((y - mu) ** 2).mean(axis=-1, keepdims=True)
    ref = (y - mu) / jnp.sqrt(var + _LN_EPS) * gamma + beta

    for name, out in (("fused", out_fused), ("tiled", out_tiled)):
        assert out.shape == ref.shape
        max_diff = float(jnp.max(jnp.abs(out - ref)))
        assert jnp.allclose(out, ref, atol=3e-2, rtol=3e-2), (
            f"{name} path mismatch vs reference: max abs diff = {max_diff}")

    print("KERNEL_OK")
</pallas_src>

<mosaic_0001>
module attributes {stable_mosaic.version = 11 : i64} {
  func.func @kernel(%arg0: i32, %arg1: memref<16x128xf32, #tpu.memory_space<vmem>>, %arg2: memref<16x128xf32, #tpu.memory_space<vmem>>, %arg3: memref<128x128xbf16, #tpu.memory_space<vmem>>, %arg4: memref<1x128xf32, #tpu.memory_space<vmem>>, %arg5: memref<128x128xbf16, #tpu.memory_space<vmem>>, %arg6: memref<1x128xf32, #tpu.memory_space<vmem>>, %arg7: memref<1x128xf32, #tpu.memory_space<vmem>>, %arg8: memref<1x128xf32, #tpu.memory_space<vmem>>, %arg9: memref<16x128xf32, #tpu.memory_space<vmem>>) attributes {dimension_semantics = [#tpu.dimension_semantics<parallel>], iteration_bounds = array<i64: 1>, scalar_prefetch = 0 : i64, scratch_operands = 0 : i64, tpu.core_type = #tpu.core_type<tc>, window_params = [{transform_indices = @transform_0, window_bounds = array<i64: 16, 128>}, {transform_indices = @transform_1, window_bounds = array<i64: 16, 128>}, {pipeline_mode = #tpu.pipeline_mode<synchronous>, transform_indices = @transform_2, window_bounds = array<i64: 128, 128>}, {pipeline_mode = #tpu.pipeline_mode<synchronous>, transform_indices = @transform_3, window_bounds = array<i64: 1, 128>}, {pipeline_mode = #tpu.pipeline_mode<synchronous>, transform_indices = @transform_4, window_bounds = array<i64: 128, 128>}, {pipeline_mode = #tpu.pipeline_mode<synchronous>, transform_indices = @transform_5, window_bounds = array<i64: 1, 128>}, {pipeline_mode = #tpu.pipeline_mode<synchronous>, transform_indices = @transform_6, window_bounds = array<i64: 1, 128>}, {pipeline_mode = #tpu.pipeline_mode<synchronous>, transform_indices = @transform_7, window_bounds = array<i64: 1, 128>}, {transform_indices = @transform_8, window_bounds = array<i64: 16, 128>}]} {
    %c0 = arith.constant 0 : index
    %c0_0 = arith.constant 0 : index
    %0 = vector.load %arg1[%c0, %c0_0] : memref<16x128xf32, #tpu.memory_space<vmem>>, vector<16x128xf32>
    %c0_1 = arith.constant 0 : index
    %c0_2 = arith.constant 0 : index
    %1 = vector.load %arg2[%c0_1, %c0_2] : memref<16x128xf32, #tpu.memory_space<vmem>>, vector<16x128xf32>
    %2 = arith.truncf %1 : vector<16x128xf32> to vector<16x128xbf16>
    %c0_3 = arith.constant 0 : index
    %c0_4 = arith.constant 0 : index
    %3 = vector.load %arg3[%c0_3, %c0_4] : memref<128x128xbf16, #tpu.memory_space<vmem>>, vector<128x128xbf16>
    %cst = arith.constant dense<0.000000e+00> : vector<16x128xf32>
    %4 = tpu.matmul %2, %3, %cst {dimension_numbers = #tpu.dot_dimension_numbers<[1], [0], [0], [1], [0, 0, 1, 1], [], []>} : vector<16x128xbf16>, vector<128x128xbf16>, vector<16x128xf32> -> vector<16x128xf32>
    %c0_5 = arith.constant 0 : index
    %c0_6 = arith.constant 0 : index
    %5 = vector.load %arg4[%c0_5, %c0_6] : memref<1x128xf32, #tpu.memory_space<vmem>>, vector<1x128xf32>
    %6 = vector.broadcast %5 : vector<1x128xf32> to vector<16x128xf32>
    %7 = arith.addf %4, %6 : vector<16x128xf32>
    %c0_7 = arith.constant 0 : index
    %c0_8 = arith.constant 0 : index
    %8 = vector.load %arg1[%c0_7, %c0_8] : memref<16x128xf32, #tpu.memory_space<vmem>>, vector<16x128xf32>
    %9 = arith.truncf %8 : vector<16x128xf32> to vector<16x128xbf16>
    %c0_9 = arith.constant 0 : index
    %c0_10 = arith.constant 0 : index
    %10 = vector.load %arg5[%c0_9, %c0_10] : memref<128x128xbf16, #tpu.memory_space<vmem>>, vector<128x128xbf16>
    %cst_11 = arith.constant dense<0.000000e+00> : vector<16x128xf32>
    %11 = tpu.matmul %9, %10, %cst_11 {dimension_numbers = #tpu.dot_dimension_numbers<[1], [0], [0], [1], [0, 0, 1, 1], [], []>} : vector<16x128xbf16>, vector<128x128xbf16>, vector<16x128xf32> -> vector<16x128xf32>
    %c0_12 = arith.constant 0 : index
    %c0_13 = arith.constant 0 : index
    %12 = vector.load %arg6[%c0_12, %c0_13] : memref<1x128xf32, #tpu.memory_space<vmem>>, vector<1x128xf32>
    %13 = vector.broadcast %12 : vector<1x128xf32> to vector<16x128xf32>
    %14 = arith.addf %11, %13 : vector<16x128xf32>
    %cst_14 = arith.constant 0.000000e+00 : f32
    %15 = vector.broadcast %cst_14 : f32 to vector<16x128xf32>
    %16 = arith.subf %15, %14 : vector<16x128xf32>
    %17 = math.exp %16 : vector<16x128xf32>
    %cst_15 = arith.constant 1.000000e+00 : f32
    %18 = vector.broadcast %cst_15 : f32 to vector<16x128xf32>
    %19 = arith.addf %18, %17 : vector<16x128xf32>
    %cst_16 = arith.constant 1.000000e+00 : f32
    %20 = vector.broadcast %cst_16 : f32 to vector<16x128xf32>
    %21 = arith.divf %20, %19 : vector<16x128xf32>
    %22 = arith.mulf %21, %7 : vector<16x128xf32>
    %23 = arith.addf %0, %22 : vector<16x128xf32>
    %cst_17 = arith.constant dense<0.000000e+00> : vector<16xf32>
    %24 = vector.multi_reduction <add>, %23, %cst_17 [1] : vector<16x128xf32> to vector<16xf32>
    %25 = vector.shape_cast %24 : vector<16xf32> to vector<16x1xf32>
    %26 = arith.mulf %23, %23 : vector<16x128xf32>
    %cst_18 = arith.constant dense<0.000000e+00> : vector<16xf32>
    %27 = vector.multi_reduction <add>, %26, %cst_18 [1] : vector<16x128xf32> to vector<16xf32>
    %28 = vector.shape_cast %27 : vector<16xf32> to vector<16x1xf32>
    %cst_19 = arith.constant 3.125000e-02 : f32
    %29 = vector.broadcast %cst_19 : f32 to vector<16x1xf32>
    %30 = arith.mulf %25, %29 : vector<16x1xf32>
    %cst_20 = arith.constant 3.125000e-02 : f32
    %31 = vector.broadcast %cst_20 : f32 to vector<16x1xf32>
    %32 = arith.mulf %28, %31 : vector<16x1xf32>
    %33 = arith.mulf %30, %30 : vector<16x1xf32>
    %34 = arith.subf %32, %33 : vector<16x1xf32>
    %cst_21 = arith.constant 9.99999974E-6 : f32
    %35 = vector.broadcast %cst_21 : f32 to vector<16x1xf32>
    %36 = arith.addf %34, %35 : vector<16x1xf32>
    %37 = math.rsqrt %36 : vector<16x1xf32>
    %38 = vector.broadcast %30 : vector<16x1xf32> to vector<16x128xf32>
    %39 = arith.subf %23, %38 : vector<16x128xf32>
    %40 = vector.broadcast %37 : vector<16x1xf32> to vector<16x128xf32>
    %41 = arith.mulf %39, %40 : vector<16x128xf32>
    %c0_22 = arith.constant 0 : index
    %c0_23 = arith.constant 0 : index
    %42 = vector.load %arg7[%c0_22, %c0_23] : memref<1x128xf32, #tpu.memory_space<vmem>>, vector<1x128xf32>
    %43 = vector.broadcast %42 : vector<1x128xf32> to vector<16x128xf32>
    %44 = arith.mulf %41, %43 : vector<16x128xf32>
    %c0_24 = arith.constant 0 : index
    %c0_25 = arith.constant 0 : index
    %45 = vector.load %arg8[%c0_24, %c0_25] : memref<1x128xf32, #tpu.memory_space<vmem>>, vector<1x128xf32>
    %46 = vector.broadcast %45 : vector<1x128xf32> to vector<16x128xf32>
    %47 = arith.addf %44, %46 : vector<16x128xf32>
    %c0_26 = arith.constant 0 : index
    %c0_27 = arith.constant 0 : index
    %48 = vector.load %arg9[%c0_26, %c0_27] : memref<16x128xf32, #tpu.memory_space<vmem>>, vector<16x128xf32>
    tpu.vector_store %arg9[%c0_26, %c0_27], %47 {strides = array<i32>} : memref<16x128xf32, #tpu.memory_space<vmem>>, vector<16x128xf32>,
    return
  }
  func.func @transform_0(%arg0: i32) -> (i32, i32) {
    %c0_i32 = arith.constant 0 : i32
    %c0_i32_0 = arith.constant 0 : i32
    return %arg0, %c0_i32 : i32, i32
  }
  func.func @transform_1(%arg0: i32) -> (i32, i32) {
    %c0_i32 = arith.constant 0 : i32
    %c0_i32_0 = arith.constant 0 : i32
    return %arg0, %c0_i32 : i32, i32
  }
  func.func @transform_2(%arg0: i32) -> (i32, i32) {
    %c0_i32 = arith.constant 0 : i32
    %c0_i32_0 = arith.constant 0 : i32
    %c0_i32_1 = arith.constant 0 : i32
    return %c0_i32, %c0_i32_0 : i32, i32
  }
  func.func @transform_3(%arg0: i32) -> (i32, i32) {
    %c0_i32 = arith.constant 0 : i32
    %c0_i32_0 = arith.constant 0 : i32
    %c0_i32_1 = arith.constant 0 : i32
    return %c0_i32, %c0_i32_0 : i32, i32
  }
  func.func @transform_4(%arg0: i32) -> (i32, i32) {
    %c0_i32 = arith.constant 0 : i32
    %c0_i32_0 = arith.constant 0 : i32
    %c0_i32_1 = arith.constant 0 : i32
    return %c0_i32, %c0_i32_0 : i32, i32
  }
  func.func @transform_5(%arg0: i32) -> (i32, i32) {
    %c0_i32 = arith.constant 0 : i32
    %c0_i32_0 = arith.constant 0 : i32
    %c0_i32_1 = arith.constant 0 : i32
    return %c0_i32, %c0_i32_0 : i32, i32
  }
  func.func @transform_6(%arg0: i32) -> (i32, i32) {
    %c0_i32 = arith.constant 0 : i32
    %c0_i32_0 = arith.constant 0 : i32
    %c0_i32_1 = arith.constant 0 : i32
    return %c0_i32, %c0_i32_0 : i32, i32
  }
  func.func @transform_7(%arg0: i32) -> (i32, i32) {
    %c0_i32 = arith.constant 0 : i32
    %c0_i32_0 = arith.constant 0 : i32
    %c0_i32_1 = arith.constant 0 : i32
    return %c0_i32, %c0_i32_0 : i32, i32
  }
  func.func @transform_8(%arg0: i32) -> (i32, i32) {
    %c0_i32 = arith.constant 0 : i32
    %c0_i32_0 = arith.constant 0 : i32
    return %arg0, %c0_i32 : i32, i32
  }
}

</mosaic_0001>

<bundles_post_ra>
// kernel: tpu_custom_call.1
= control target key start
LH: loop header
LB: loop body
LE: loop exit
PB: predicated region body
PF: predicated region fallthrough
CT: control target
= control target key end

     0   :  { %13 = vsyncpa [#allocation3], 0  ;;  %s711_s0 = inlined_call_operand.hbm [shape: f32[16,128], index: 0, kind: input, shape index: {}]   ;;  %s712_s1 = inlined_call_operand.hbm [shape: f32[16,128], index: 1, kind: input, shape index: {}]   ;;  %s713_s2 = inlined_call_operand.hbm [shape: bf16[128,128], index: 2, kind: input, shape index: {}]   ;;  %s714_s3 = inlined_call_operand.vmem [shape: f32[1,128], index: 3, kind: input, shape index: {}]   ;;  %s715_s4 = inlined_call_operand.hbm [shape: bf16[128,128], index: 4, kind: input, shape index: {}]   ;;  %s716_s5 = inlined_call_operand.vmem [shape: f32[1,128], index: 5, kind: input, shape index: {}]   ;;  %s717_s6 = inlined_call_operand.vmem [shape: f32[1,128], index: 6, kind: input, shape index: {}]   ;;  %s718_s7 = inlined_call_operand.vmem [shape: f32[1,128], index: 7, kind: input, shape index: {}]   ;;  %s719_s8 = inlined_call_operand.hbm [shape: f32[16,128], index: 8, kind: output, shape index: {}]  }
   0x1   :  { %14 = vsyncpa [#allocation6], 0 }
   0x2   :  { %15 = vsyncpa [#allocation9], 0 }
   0x3   :  { %16 = vsyncpa [#allocation4], 0  ;;  %s34_s29 = sshll.u32 %s712_s1, 4  ;;  %s617_s30 = smov [#allocation5]   ;;  %s35_s29 = int_to_ptr.hbm [resolvable:$true] %s34_s29 }
   0x4   :  { %s36_s9 = sshll.u32 %s617_s30, 4  ;;  %s21_s12 = sshll.u32 %s711_s0, 4  ;;  %s37_s9 = int_to_ptr.vmem [resolvable:$true] %s36_s9  ;;  %s22_s12 = int_to_ptr.hbm [resolvable:$true] %s21_s12 }
   0x5   :  { %s618_s13 = smov 128   ;;  %s619_s14 = smov 8  }
   0x6   :  { %42 = dma.hbm_to_vmem [thread:$0]  %s35_s29, 256, %s37_s9, [#allocation6], %s618_s13, %s618_s13, %s619_s14  }
   0x7   :  { %s620_s15 = smov [#allocation2]   ;;  %s47_s1 = sshll.u32 %s713_s2, 4  ;;  %s48_s1 = int_to_ptr.hbm [resolvable:$true] %s47_s1 }
   0x8   :  { %s23_s16 = sshll.u32 %s620_s15, 4  ;;  %s621_s0 = smov [#allocation7]   ;;  %s24_s16 = int_to_ptr.vmem [resolvable:$true] %s23_s16 }
   0x9   :  { %29 = dma.hbm_to_vmem [thread:$0]  %s22_s12, 256, %s24_s16, [#allocation3], %s618_s13, %s618_s13, %s619_s14  }
   0xa   :  { %s49_s19 = sshll.u32 %s621_s0, 4  ;;  %s62_s22 = sshll.u32 %s715_s4, 4  ;;  %s50_s19 = int_to_ptr.vmem [resolvable:$true] %s49_s19  ;;  %s63_s22 = int_to_ptr.hbm [resolvable:$true] %s62_s22 }
   0xb   :  { %s622_s23 = smov 64   ;;  %s623_s24 = smov 4  }
   0xc   :  { %55 = dma.hbm_to_vmem [thread:$0]  %s48_s1, 1024, %s50_s19, [#allocation6], %s622_s23, %s622_s23, %s623_s24  }
   0xd   :  { %s624_s25 = smov [#allocation8]  }
   0xe   :  { %s64_s26 = sshll.u32 %s624_s25, 4  ;;  %s65_s26 = int_to_ptr.vmem [resolvable:$true] %s64_s26 }
   0xf   :  { %70 = dma.hbm_to_vmem [thread:$0]  %s63_s22, 1024, %s65_s26, [#allocation9], %s622_s23, %s622_s23, %s623_s24  }
  0x10   :  { %609 = dma.done.wait [#allocation3], 256  }
  0x11   :  { %610 = vsyncadd [#allocation3], 4294967040 }
  0x12   :  { %611 = dma.done.wait [#allocation6], 1280  }
  0x13   :  { %612 = vsyncadd [#allocation6], 4294966016 }
  0x14   :  { %613 = dma.done.wait [#allocation9], 1024  }
  0x15   :  { %614 = vsyncadd [#allocation9], 4294966272  ;;  %v463_v0 = vld [vmem:[#allocation8 + $0x38] sm:$0xff]  ;;  %v462_v1 = vld [vmem:[#allocation8 + $0x30] sm:$0xff]  ;;  %s369_s12 = sshll.u32 %s719_s8, 4  ;;  %s370_s12 = int_to_ptr.hbm [resolvable:$true] %s369_s12 }
  0x16   :  { %249 = vmatpush.bf16.msra.mxu1 %v463_v0  ;;  %v455_v2 = vld [vmem:[#allocation7 + $0x38] sm:$0xff]  ;;  %v454_v3 = vld [vmem:[#allocation7 + $0x30] sm:$0xff]  ;;  %v461_v4 = vld [vmem:[#allocation8 + $0x28] sm:$0xff] }
  0x17   :  { %166 = vmatpush.bf16.msra.mxu0 %v455_v2  ;;  %v453_v5 = vld [vmem:[#allocation7 + $0x28] sm:$0xff]  ;;  %v460_v6 = vld [vmem:[#allocation8 + $0x20] sm:$0xff]  ;;  %v459_v8 = vld [vmem:[#allocation8 + $0x18] sm:$0xff] }
  0x18   :  { %v452_v7 = vld [vmem:[#allocation7 + $0x20] sm:$0xff]  ;;  %v451_v9 = vld [vmem:[#allocation7 + $0x18] sm:$0xff]  ;;  %v458_v10 = vld [vmem:[#allocation8 + $0x10] sm:$0xff] }
  0x19   :  { %v450_v11 = vld [vmem:[#allocation7 + $0x10] sm:$0xff]  ;;  %v457_v12 = vld [vmem:[#allocation8 + $0x8] sm:$0xff]  ;;  %v456_v14 = vld [vmem:[#allocation8] sm:$0xff] }
  0x1a   :  { %250 = vmatpush.bf16.msra.mxu1 %v462_v1  ;;  %v449_v13 = vld [vmem:[#allocation7 + $0x8] sm:$0xff]  ;;  %v93_v15 = vld [vmem:[#allocation2] sm:$0xff]  ;;  %v95_v18 = vld [vmem:[#allocation5] sm:$0xff] }
  0x1b   :  { %167 = vmatpush.bf16.msra.mxu0 %v454_v3  ;;  %v689_v16 = vld [vmem:[#allocation2 + $0x8] sm:$0xff]  ;;  %v448_v17 = vld [vmem:[#allocation7] sm:$0xff]  ;;  %v96_v19 = vld [vmem:[#allocation5 + $0x8] sm:$0xff] }
  0x1c   :  { %v180_v20 = vpack.c.bf16 %v689_v16, %v93_v15  ;;  %v97_v21 = vpack.c.bf16 %v96_v19, %v95_v18  ;;  %v473_v22 = vld [vmem:[%s716_s5] ss:$0 sm:$0xff] }
  0x1d   :  { %v474_v37 = vld [vmem:[%s714_s3] ss:$0 sm:$0xff] }
  0x1e   :  { %251 = vmatpush.bf16.msra.mxu1 %v461_v4 }
  0x1f   :  { %168 = vmatpush.bf16.msra.mxu0 %v453_v5 }
  0x22   :  { %252 = vmatpush.bf16.msra.mxu1 %v460_v6 }
  0x23   :  { %169 = vmatpush.bf16.msra.mxu0 %v452_v7 }
  0x26   :  { %253 = vmatpush.bf16.msra.mxu1 %v459_v8 }
  0x27   :  { %170 = vmatpush.bf16.msra.mxu0 %v451_v9 }
  0x2a   :  { %254 = vmatpush.bf16.msra.mxu1 %v458_v10 }
  0x2b   :  { %171 = vmatpush.bf16.msra.mxu0 %v450_v11 }
  0x2e   :  { %255 = vmatpush.bf16.msra.mxu1 %v457_v12 }
  0x2f   :  { %172 = vmatpush.bf16.msra.mxu0 %v449_v13 }
  0x32   :  { %256 = vmatpush.bf16.msra.mxu1 %v456_v14 }
  0x33   :  { %173 = vmatpush.bf16.msra.mxu0 %v448_v17 }
  0x35   :  { %257 = vmatmul.bf16.vlgmr.msra.gmra.mxu1 %v180_v20 }
  0x36   :  { %174 = vmatmul.bf16.vlgmr.msra.gmra.mxu0 %v97_v21 }
  0xb2   :  { %v258_v23 = vpop.f32.mrf.mxu1 }
  0xb3   :  { %v259_v24 = vadd.f32 %v473_v22, %v258_v23  ;;  %v175_v39 = vpop.f32.mrf.mxu0 }
  0xb4   :  { %v176_v43 = vadd.f32 %v474_v37, %v175_v39 }
  0xb5   :  { %v263_v25 = vsub.f32 0.0, %v259_v24 }
  0xb7   :  { %v265_v26 = vmul.f32 1.442695, %v263_v25  ;;  %v475_v25 = vld [vmem:[%s717_s6] ss:$0 sm:$0xff]  ;;  %s625_s6 = smov [#allocation10]  }
  0xb8   :  { %s367_s9 = sshll.u32 %s625_s6, 4  ;;  %s368_s9 = int_to_ptr.vmem [resolvable:$true] %s367_s9 }
  0xb9   :  { %477 = vpow2.f32 %v265_v26 }
  0xba   :  { %v260_v27 = vpop.f32.mrf.mxu1 }
  0xbb   :  { %v261_v28 = vadd.f32 %v473_v22, %v260_v27  ;;  %v177_v56 = vpop.f32.mrf.mxu0 }
  0xbc   :  { %v178_v60 = vadd.f32 %v474_v37, %v177_v56 }
  0xbd   :  { %v264_v29 = vsub.f32 0.0, %v261_v28 }
  0xbf   :  { %v478_v30 = vpop.eup %477  ;;  %v267_v31 = vmul.f32 1.442695, %v264_v29  ;;  %v476_v29 = vld [vmem:[%s718_s7] ss:$0 sm:$0xff] }
  0xc0   :  { %v269_v32 = vadd.f32 1.0, %v478_v30 }
  0xc1   :  { %479 = vpow2.f32 %v267_v31 }
  0xc2   :  { %481 = vrcp.f32 %v269_v32  ;;  %v282_v40 = vand.u32 2147483648, %v269_v32  ;;  %v280_v42 = vand.u32 2147483647, %v269_v32  ;;  %vm276_vm1 = vweird.f32 %v269_v32 }
  0xc4   :  { %v283_v46 = vor.u32 1.1754944e-38, %v282_v40  ;;  %vm281_vm3 = vcmp.eq.f32.partialorder %v280_v42, 8.507059e+37 }
  0xc7   :  { %v480_v33 = vpop.eup %479 }
  0xc8   :  { %v482_v34 = vpop.eup %481  ;;  %v270_v35 = vadd.f32 1.0, %v480_v33 }
  0xc9   :  { %v272_v36 = vmul.f32 %v482_v34, %v269_v32  ;;  %vm277_vm0 = vweird.f32 %v482_v34 }
  0xca   :  { %483 = vrcp.f32 %v270_v35  ;;  %vm278_vm2 = vmor %vm276_vm1, %vm277_vm0  ;;  %v297_v52 = vand.u32 2147483648, %v270_v35  ;;  %v295_v54 = vand.u32 2147483647, %v270_v35  ;;  %vm291_vm5 = vweird.f32 %v270_v35 }
  0xcb   :  { %v273_v38 = vsub.f32 1.0, %v272_v36 }
  0xcc   :  { %v298_v59 = vor.u32 1.1754944e-38, %v297_v52  ;;  %vm296_vm7 = vcmp.eq.f32.partialorder %v295_v54, 8.507059e+37 }
  0xcd   :  { %v274_v41 = vmul.f32 %v482_v34, %v273_v38 }
  0xcf   :  { %v275_v44 = vadd.f32 %v482_v34, %v274_v41 }
  0xd0   :  { %v484_v45 = vpop.eup %483 }
  0xd1   :  { %v279_v47 = vsel %vm278_vm2, %v482_v34, %v275_v44  ;;  %v287_v48 = vmul.f32 %v484_v45, %v270_v35  ;;  %vm292_vm4 = vweird.f32 %v484_v45 }
  0xd2   :  { %v284_v49 = vsel %vm281_vm3, %v283_v46, %v279_v47  ;;  %vm293_vm6 = vmor %vm291_vm5, %vm292_vm4 }
  0xd3   :  { %v301_v50 = vmul.f32 %v284_v49, %v176_v43  ;;  %v288_v51 = vsub.f32 1.0, %v287_v48 }
  0xd5   :  { %v289_v53 = vmul.f32 %v484_v45, %v288_v51  ;;  %v303_v55 = vadd.f32 %v301_v50, %v93_v15 }
  0xd7   :  { %v290_v57 = vadd.f32 %v484_v45, %v289_v53  ;;  %305 = vadd.xlane.f32.xlu0 %v303_v55  ;;  %v309_v58 = vmul.f32 %v303_v55, %v303_v55 }
  0xd9   :  { %v294_v61 = vsel %vm293_vm6, %v484_v45, %v290_v57  ;;  %311 = vadd.xlane.f32.xlu1 %v309_v58 }
  0xda   :  { %v299_v62 = vsel %vm296_vm7, %v298_v59, %v294_v61 }
  0xdb   :  { %v302_v63 = vmul.f32 %v299_v62, %v178_v60 }
  0xdd   :  { %v304_v0 = vadd.f32 %v302_v63, %v689_v16 }
  0xdf   :  { %307 = vadd.xlane.f32.xlu0 %v304_v0  ;;  %v310_v1 = vmul.f32 %v304_v0, %v304_v0 }
  0xe1   :  { %313 = vadd.xlane.f32.xlu1 %v310_v1 }
 0x14a   :  { %v306_v2 = vpop.xlane.xlu0 %305 }
 0x14b   :  { %v315_v3 = vmul.f32 0.03125, %v306_v2 }
 0x14c   :  { %v312_v4 = vpop.xlane.xlu1 %311 }
 0x14d   :  { %v319_v5 = vmul.f32 %v315_v3, %v315_v3  ;;  %v317_v6 = vmul.f32 0.03125, %v312_v4  ;;  %v345_v24 = vsub.f32 %v303_v55, %v315_v3 }
 0x14f   :  { %v321_v7 = vsub.f32 %v317_v6, %v319_v5 }
 0x151   :  { %v323_v8 = vadd.f32 1e-05, %v321_v7 }
 0x152   :  { %v308_v9 = vpop.xlane.xlu0 %307 }
 0x153   :  { %485 = vrsqrt.f32 %v323_v8  ;;  %v316_v10 = vmul.f32 0.03125, %v308_v9  ;;  %vm331_vm9 = vweird.f32 %v323_v8 }
 0x154   :  { %v314_v11 = vpop.xlane.xlu1 %313 }
 0x155   :  { %v320_v12 = vmul.f32 %v316_v10, %v316_v10  ;;  %v318_v13 = vmul.f32 0.03125, %v314_v11  ;;  %v346_v35 = vsub.f32 %v304_v0, %v316_v10 }
 0x157   :  { %v322_v14 = vsub.f32 %v318_v13, %v320_v12 }
 0x159   :  { %v486_v15 = vpop.eup %485  ;;  %v324_v17 = vadd.f32 1e-05, %v322_v14 }
 0x15a   :  { %v326_v16 = vmul.f32 %v486_v15, %v323_v8  ;;  %vm332_vm8 = vweird.f32 %v486_v15 }
 0x15b   :  { %487 = vrsqrt.f32 %v324_v17  ;;  %vm333_vm10 = vmor %vm331_vm9, %vm332_vm8  ;;  %vm341_vm12 = vweird.f32 %v324_v17 }
 0x15c   :  { %v327_v18 = vmul.f32 %v486_v15, %v326_v16 }
 0x15e   :  { %v328_v19 = vmul.f32 0.5, %v327_v18 }
 0x160   :  { %v329_v20 = vsub.f32 1.5, %v328_v19 }
 0x161   :  { %v488_v21 = vpop.eup %487 }
 0x162   :  { %v330_v22 = vmul.f32 %v486_v15, %v329_v20  ;;  %v336_v23 = vmul.f32 %v488_v21, %v324_v17  ;;  %vm342_vm11 = vweird.f32 %v488_v21 }
 0x163   :  { %vm343_vm13 = vmor %vm341_vm12, %vm342_vm11 }
 0x164   :  { %v334_v26 = vsel %vm333_vm10, %v486_v15, %v330_v22  ;;  %v337_v27 = vmul.f32 %v488_v21, %v336_v23 }
 0x165   :  { %v347_v28 = vmul.f32 %v345_v24, %v334_v26 }
 0x166   :  { %v338_v30 = vmul.f32 0.5, %v337_v27 }
 0x167   :  { %v353_v31 = vmul.f32 %v475_v25, %v347_v28 }
 0x168   :  { %v339_v32 = vsub.f32 1.5, %v338_v30 }
 0x169   :  { %v359_v33 = vadd.f32 %v476_v29, %v353_v31 }
 0x16a   :  { %v340_v34 = vmul.f32 %v488_v21, %v339_v32 }
 0x16b   :  { %361 = vst [vmem:[#allocation10] sm:$0xff] %v359_v33 }
 0x16c   :  { %v344_v36 = vsel %vm343_vm13, %v488_v21, %v340_v34 }
 0x16d   :  { %v348_v37 = vmul.f32 %v346_v35, %v344_v36 }
 0x16f   :  { %v354_v38 = vmul.f32 %v475_v25, %v348_v37 }
 0x171   :  { %v360_v39 = vadd.f32 %v476_v29, %v354_v38 }
 0x173   :  { %362 = vst [vmem:[#allocation10 + $0x8] sm:$0xff] %v360_v39 }
 0x174   :  { %375 = dma.vmem_to_hbm [thread:$0]  %s368_s9, 256, %s370_s12, [#allocation4], %s618_s13, %s618_s13, %s619_s14  }
 0x175   :  { %615 = dma.done.wait [#allocation4], 256  }
 0x176   :  { %616 = vsyncadd [#allocation4], 4294967040 }
 0x177   :  { %380 = vsyncpa [#allocation3], 1 }
 0x178   :  { %381 = vsyncpa [#allocation6], 1 }
 0x179   :  { %382 = vsyncpa [#allocation9], 1 }
 0x17a   :  { %383 = vsyncpa [#allocation4], 1 }

</bundles_post_ra>
